<compile_context>
chip_gen: v7x
topology: tpu7x:2x2x1
jax: 0.10.0
libtpu: 0.0.40
codegen_flags: <defaults>
</compile_context>

<pallas_src>
import functools

import jax
import jax.numpy as jnp
from jax.experimental import pallas as pl
from jax.experimental.pallas import tpu as pltpu


def _round_up(n, m):
    return ((n + m - 1) // m) * m


def _adapter_kernel(x_ref, gamma_ref, beta_ref,
                    wd_ref, bd_ref, wu_ref, bu_ref,
                    o_ref, *, scale, ln_option, eps, d_real, d_padded):
    """One row-tile of tokens: LN -> down-proj -> ReLU -> up-proj -> scale.

    Feature dims may be zero-padded to lane multiples (d_padded=True); padded
    gamma/beta/bias/weight entries are zero so padded lanes stay exactly zero,
    and the LayerNorm statistics are computed over the real width d_real.
    """
    x = x_ref[...].astype(jnp.float32)                      # (tm, Dp)
    inv_d = 1.0 / float(d_real)

    def layernorm(v):
        # mean over the real feature count (padded lanes of v are exactly 0).
        mean = jnp.sum(v, axis=-1, keepdims=True) * inv_d
        centered = v - mean
        if d_padded:
            lane = jax.lax.broadcasted_iota(jnp.int32, v.shape, 1)
            centered = jnp.where(lane < d_real, centered, 0.0)
        var = jnp.sum(centered * centered, axis=-1, keepdims=True) * inv_d
        vn = centered * jax.lax.rsqrt(var + eps)
        # gamma/beta are zero on padded lanes -> padded lanes stay 0.
        return vn * gamma_ref[...] + beta_ref[...]

    h = layernorm(x) if ln_option == "in" else x

    # Down projection + ReLU. bf16 operands, f32 accumulation (native MXU).
    down = jnp.dot(h.astype(wd_ref.dtype), wd_ref[...],
                   preferred_element_type=jnp.float32)
    down = jnp.maximum(down + bd_ref[...], 0.0)
    # TODO(synk): dropout is a no-op here (p=0.0 / eval mode); add stateful
    # PRNG masking with pltpu.prng_random_bits if training-mode dropout needed.

    # Up projection.
    up = jnp.dot(down.astype(wu_ref.dtype), wu_ref[...],
                 preferred_element_type=jnp.float32)
    up = up + bu_ref[...]

    out = up * scale
    if ln_option == "out":
        out = layernorm(out)

    o_ref[...] = out.astype(o_ref.dtype)


def prepare_params(params, weight_dtype=jnp.bfloat16):
    """One-time (parameter-load-time) pad to lane multiples + bf16 cast.

    Hoisted out of the forward so no pad/cast ops sit on the per-call path.
    """
    D, H = params["wd"].shape
    Dp = _round_up(D, 128)
    Hp = _round_up(H, 128)
    return {
        "D": D, "H": H, "Dp": Dp, "Hp": Hp,
        "gamma": jnp.pad(params["gamma"], (0, Dp - D)).reshape(1, Dp),
        "beta": jnp.pad(params["beta"], (0, Dp - D)).reshape(1, Dp),
        "wd": jnp.pad(params["wd"], ((0, Dp - D), (0, Hp - H))).astype(weight_dtype),
        "bd": jnp.pad(params["bd"], (0, Hp - H)).reshape(1, Hp),
        "wu": jnp.pad(params["wu"], ((0, Hp - H), (0, Dp - D))).astype(weight_dtype),
        "bu": jnp.pad(params["bu"], (0, Dp - D)).reshape(1, Dp),
    }


def adapter_forward(x, prep, *, scale=1.0, adapter_layernorm_option="in",
                    tm=512, eps=1e-5):
    """x: (B, S, D). prep: output of prepare_params()."""
    B, S, D = x.shape
    Dp, Hp = prep["Dp"], prep["Hp"]
    M = B * S

    # Row tile: multiple of 8, clamped so the grid has >= 2 steps when
    # possible (v7x has 2 TensorCores; "parallel" shards the grid over them).
    tm_eff = max(8, min(tm, _round_up(pl.cdiv(M, 2), 8)))
    tm_eff = _round_up(tm_eff, 8)
    grid = (pl.cdiv(M, tm_eff),)

    d_padded = (Dp != D)
    if d_padded:
        # Rare fallback (SAM dims are multiples of 128): pad the feature dim.
        x2d = jnp.pad(x.reshape(M, D), ((0, 0), (0, Dp - D)))
    else:
        x2d = x.reshape(M, D)          # contiguous reshape: no copy

    # VMEM budget: double-buffered in/out row tiles + (double-buffered)
    # weights + intermediates, clamped to 48 MiB (fits v7x's 64 MiB physical
    # VMEM; well under v5e/v6e's 128 MiB while beating v5e's 16 MiB default).
    tile_bytes = tm_eff * Dp * 4
    w_itemsize = prep["wd"].dtype.itemsize
    weight_bytes = 2 * 2 * Dp * Hp * w_itemsize + 4 * 2 * (Dp + Hp) * 4
    inter_bytes = 4 * tm_eff * (Dp + Hp) * 4
    vmem_bytes = 4 * tile_bytes + weight_bytes + inter_bytes + (4 << 20)
    vmem_bytes = int(min(max(vmem_bytes, 16 << 20), 48 << 20))

    kernel = functools.partial(
        _adapter_kernel,
        scale=float(scale),
        ln_option=adapter_layernorm_option,
        eps=float(eps),
        d_real=int(D),
        d_padded=d_padded)

    out2d = pl.pallas_call(
        kernel,
        out_shape=jax.ShapeDtypeStruct((M, Dp), x.dtype),
        grid=grid,
        in_specs=[
            pl.BlockSpec((tm_eff, Dp), lambda i: (i, 0)),   # x row tile
            pl.BlockSpec((1, Dp), lambda i: (0, 0)),        # LN gamma
            pl.BlockSpec((1, Dp), lambda i: (0, 0)),        # LN beta
            pl.BlockSpec((Dp, Hp), lambda i: (0, 0)),       # W_down (bf16)
            pl.BlockSpec((1, Hp), lambda i: (0, 0)),        # b_down
            pl.BlockSpec((Hp, Dp), lambda i: (0, 0)),       # W_up (bf16)
            pl.BlockSpec((1, Dp), lambda i: (0, 0)),        # b_up
        ],
        out_specs=pl.BlockSpec((tm_eff, Dp), lambda i: (i, 0)),
        compiler_params=pltpu.CompilerParams(
            dimension_semantics=("parallel",),
            vmem_limit_bytes=vmem_bytes),
    )(x2d, prep["gamma"], prep["beta"], prep["wd"], prep["bd"],
      prep["wu"], prep["bu"])

    if d_padded:
        out2d = out2d[:, :D]
    return out2d.reshape(B, S, D)


def adapter_reference(x, params, *, scale=1.0,
                      adapter_layernorm_option="in", eps=1e-5):
    """Pure-JAX reference matching the PyTorch module semantics (f32)."""
    def ln(v):
        mean = jnp.mean(v, axis=-1, keepdims=True)
        var = jnp.mean((v - mean) ** 2, axis=-1, keepdims=True)
        return (v - mean) / jnp.sqrt(var + eps) * params["gamma"] + params["beta"]

    h = ln(x) if adapter_layernorm_option == "in" else x
    down = jnp.maximum(h @ params["wd"] + params["bd"], 0.0)
    up = down @ params["wu"] + params["bu"]
    out = up * scale
    if adapter_layernorm_option == "out":
        out = ln(out)
    return out


def init_params(key, input_dim, output_dim):
    """Deterministic synthetic params (shapes follow nn.Linear / nn.LayerNorm)."""
    k1, k2, k3, k4 = jax.random.split(key, 4)
    lim_d = 1.0 / jnp.sqrt(input_dim)
    lim_u = 1.0 / jnp.sqrt(output_dim)
    return {
        "gamma": jnp.ones((input_dim,), jnp.float32),
        "beta": jnp.zeros((input_dim,), jnp.float32),
        # stored as (in_features, out_features) so forward is x @ W + b
        "wd": jax.random.uniform(k1, (input_dim, output_dim), jnp.float32,
                                 -lim_d, lim_d),
        "bd": jax.random.uniform(k2, (output_dim,), jnp.float32, -lim_d, lim_d),
        "wu": jax.random.uniform(k3, (output_dim, input_dim), jnp.float32,
                                 -lim_u, lim_u),
        "bu": jax.random.uniform(k4, (input_dim,), jnp.float32, -lim_u, lim_u),
    }


if __name__ == "__main__":
    key = jax.random.PRNGKey(0)

    configs = [
        # Fast path: D multiple of 128 (no host-side pad/slice), 2-step grid.
        dict(B=2, S=8, D=128, H=32),
        # Fallback path: padded D/H lanes + ragged row count (M = 10).
        dict(B=2, S=5, D=96, H=24),
    ]

    for idx, cfg in enumerate(configs):
        kx, kp = jax.random.split(jax.random.fold_in(key, idx))
        x = jax.random.normal(kx, (cfg["B"], cfg["S"], cfg["D"]), jnp.float32)
        params = init_params(kp, cfg["D"], cfg["H"])
        prep = prepare_params(params)      # once, at parameter-load time

        out = adapter_forward(x, prep, scale=1.0,
                              adapter_layernorm_option="in")
        out = jax.block_until_ready(out)

        ref = adapter_reference(x, params, scale=1.0,
                                adapter_layernorm_option="in")
        assert out.shape == x.shape
        # bf16 matmul operands (f32 accumulation) -> looser tolerance vs f32 ref.
        assert jnp.allclose(out, ref, atol=3e-2, rtol=3e-2), \
            f"mismatch vs reference (config {idx})"

    print("KERNEL_OK")
</pallas_src>

<mosaic_0001>
module attributes {stable_mosaic.version = 11 : i64} {
  func.func @_adapter_kernel(%arg0: i32, %arg1: memref<8x128xf32, #tpu.memory_space<vmem>>, %arg2: memref<1x128xf32, #tpu.memory_space<vmem>>, %arg3: memref<1x128xf32, #tpu.memory_space<vmem>>, %arg4: memref<128x128xbf16, #tpu.memory_space<vmem>>, %arg5: memref<1x128xf32, #tpu.memory_space<vmem>>, %arg6: memref<128x128xbf16, #tpu.memory_space<vmem>>, %arg7: memref<1x128xf32, #tpu.memory_space<vmem>>, %arg8: memref<8x128xf32, #tpu.memory_space<vmem>>) attributes {dimension_semantics = [#tpu.dimension_semantics<parallel>], iteration_bounds = array<i64: 2>, scalar_prefetch = 0 : i64, scratch_operands = 0 : i64, tpu.core_type = #tpu.core_type<tc>, window_params = [{transform_indices = @transform_0, window_bounds = array<i64: 8, 128>}, {pipeline_mode = #tpu.pipeline_mode<synchronous>, transform_indices = @transform_1, window_bounds = array<i64: 1, 128>}, {pipeline_mode = #tpu.pipeline_mode<synchronous>, transform_indices = @transform_2, window_bounds = array<i64: 1, 128>}, {pipeline_mode = #tpu.pipeline_mode<synchronous>, transform_indices = @transform_3, window_bounds = array<i64: 128, 128>}, {pipeline_mode = #tpu.pipeline_mode<synchronous>, transform_indices = @transform_4, window_bounds = array<i64: 1, 128>}, {pipeline_mode = #tpu.pipeline_mode<synchronous>, transform_indices = @transform_5, window_bounds = array<i64: 128, 128>}, {pipeline_mode = #tpu.pipeline_mode<synchronous>, transform_indices = @transform_6, window_bounds = array<i64: 1, 128>}, {transform_indices = @transform_7, window_bounds = array<i64: 8, 128>}]} {
    %c0 = arith.constant 0 : index
    %c0_0 = arith.constant 0 : index
    %0 = vector.load %arg1[%c0, %c0_0] : memref<8x128xf32, #tpu.memory_space<vmem>>, vector<8x128xf32>
    %cst = arith.constant dense<0.000000e+00> : vector<8xf32>
    %1 = vector.multi_reduction <add>, %0, %cst [1] : vector<8x128xf32> to vector<8xf32>
    %2 = vector.shape_cast %1 : vector<8xf32> to vector<8x1xf32>
    %cst_1 = arith.constant 7.812500e-03 : f32
    %3 = vector.broadcast %cst_1 : f32 to vector<8x1xf32>
    %4 = arith.mulf %2, %3 : vector<8x1xf32>
    %5 = vector.broadcast %4 : vector<8x1xf32> to vector<8x128xf32>
    %6 = arith.subf %0, %5 : vector<8x128xf32>
    %7 = arith.mulf %6, %6 : vector<8x128xf32>
    %cst_2 = arith.constant dense<0.000000e+00> : vector<8xf32>
    %8 = vector.multi_reduction <add>, %7, %cst_2 [1] : vector<8x128xf32> to vector<8xf32>
    %9 = vector.shape_cast %8 : vector<8xf32> to vector<8x1xf32>
    %cst_3 = arith.constant 7.812500e-03 : f32
    %10 = vector.broadcast %cst_3 : f32 to vector<8x1xf32>
    %11 = arith.mulf %9, %10 : vector<8x1xf32>
    %cst_4 = arith.constant 9.99999974E-6 : f32
    %12 = vector.broadcast %cst_4 : f32 to vector<8x1xf32>
    %13 = arith.addf %11, %12 : vector<8x1xf32>
    %14 = math.rsqrt %13 : vector<8x1xf32>
    %15 = vector.broadcast %14 : vector<8x1xf32> to vector<8x128xf32>
    %16 = arith.mulf %6, %15 : vector<8x128xf32>
    %c0_5 = arith.constant 0 : index
    %c0_6 = arith.constant 0 : index
    %17 = vector.load %arg2[%c0_5, %c0_6] : memref<1x128xf32, #tpu.memory_space<vmem>>, vector<1x128xf32>
    %18 = vector.broadcast %17 : vector<1x128xf32> to vector<8x128xf32>
    %19 = arith.mulf %16, %18 : vector<8x128xf32>
    %c0_7 = arith.constant 0 : index
    %c0_8 = arith.constant 0 : index
    %20 = vector.load %arg3[%c0_7, %c0_8] : memref<1x128xf32, #tpu.memory_space<vmem>>, vector<1x128xf32>
    %21 = vector.broadcast %20 : vector<1x128xf32> to vector<8x128xf32>
    %22 = arith.addf %19, %21 : vector<8x128xf32>
    %23 = arith.truncf %22 : vector<8x128xf32> to vector<8x128xbf16>
    %c0_9 = arith.constant 0 : index
    %c0_10 = arith.constant 0 : index
    %24 = vector.load %arg4[%c0_9, %c0_10] : memref<128x128xbf16, #tpu.memory_space<vmem>>, vector<128x128xbf16>
    %cst_11 = arith.constant dense<0.000000e+00> : vector<8x128xf32>
    %25 = tpu.matmul %23, %24, %cst_11 {dimension_numbers = #tpu.dot_dimension_numbers<[1], [0], [0], [1], [0, 0, 1, 1], [], []>} : vector<8x128xbf16>, vector<128x128xbf16>, vector<8x128xf32> -> vector<8x128xf32>
    %c0_12 = arith.constant 0 : index
    %c0_13 = arith.constant 0 : index
    %26 = vector.load %arg5[%c0_12, %c0_13] : memref<1x128xf32, #tpu.memory_space<vmem>>, vector<1x128xf32>
    %27 = vector.broadcast %26 : vector<1x128xf32> to vector<8x128xf32>
    %28 = arith.addf %25, %27 : vector<8x128xf32>
    %cst_14 = arith.constant 0.000000e+00 : f32
    %29 = vector.broadcast %cst_14 : f32 to vector<8x128xf32>
    %30 = arith.maximumf %28, %29 : vector<8x128xf32>
    %31 = arith.truncf %30 : vector<8x128xf32> to vector<8x128xbf16>
    %c0_15 = arith.constant 0 : index
    %c0_16 = arith.constant 0 : index
    %32 = vector.load %arg6[%c0_15, %c0_16] : memref<128x128xbf16, #tpu.memory_space<vmem>>, vector<128x128xbf16>
    %cst_17 = arith.constant dense<0.000000e+00> : vector<8x128xf32>
    %33 = tpu.matmul %31, %32, %cst_17 {dimension_numbers = #tpu.dot_dimension_numbers<[1], [0], [0], [1], [0, 0, 1, 1], [], []>} : vector<8x128xbf16>, vector<128x128xbf16>, vector<8x128xf32> -> vector<8x128xf32>
    %c0_18 = arith.constant 0 : index
    %c0_19 = arith.constant 0 : index
    %34 = vector.load %arg7[%c0_18, %c0_19] : memref<1x128xf32, #tpu.memory_space<vmem>>, vector<1x128xf32>
    %35 = vector.broadcast %34 : vector<1x128xf32> to vector<8x128xf32>
    %36 = arith.addf %33, %35 : vector<8x128xf32>
    %cst_20 = arith.constant 1.000000e+00 : f32
    %37 = vector.broadcast %cst_20 : f32 to vector<8x128xf32>
    %38 = arith.mulf %36, %37 : vector<8x128xf32>
    %c0_21 = arith.constant 0 : index
    %c0_22 = arith.constant 0 : index
    %39 = vector.load %arg8[%c0_21, %c0_22] : memref<8x128xf32, #tpu.memory_space<vmem>>, vector<8x128xf32>
    tpu.vector_store %arg8[%c0_21, %c0_22], %38 {strides = array<i32>} : memref<8x128xf32, #tpu.memory_space<vmem>>, vector<8x128xf32>,
    return
  }
  func.func @transform_0(%arg0: i32) -> (i32, i32) {
    %c0_i32 = arith.constant 0 : i32
    %c0_i32_0 = arith.constant 0 : i32
    return %arg0, %c0_i32 : i32, i32
  }
  func.func @transform_1(%arg0: i32) -> (i32, i32) {
    %c0_i32 = arith.constant 0 : i32
    %c0_i32_0 = arith.constant 0 : i32
    %c0_i32_1 = arith.constant 0 : i32
    return %c0_i32, %c0_i32_0 : i32, i32
  }
  func.func @transform_2(%arg0: i32) -> (i32, i32) {
    %c0_i32 = arith.constant 0 : i32
    %c0_i32_0 = arith.constant 0 : i32
    %c0_i32_1 = arith.constant 0 : i32
    return %c0_i32, %c0_i32_0 : i32, i32
  }
  func.func @transform_3(%arg0: i32) -> (i32, i32) {
    %c0_i32 = arith.constant 0 : i32
    %c0_i32_0 = arith.constant 0 : i32
    %c0_i32_1 = arith.constant 0 : i32
    return %c0_i32, %c0_i32_0 : i32, i32
  }
  func.func @transform_4(%arg0: i32) -> (i32, i32) {
    %c0_i32 = arith.constant 0 : i32
    %c0_i32_0 = arith.constant 0 : i32
    %c0_i32_1 = arith.constant 0 : i32
    return %c0_i32, %c0_i32_0 : i32, i32
  }
  func.func @transform_5(%arg0: i32) -> (i32, i32) {
    %c0_i32 = arith.constant 0 : i32
    %c0_i32_0 = arith.constant 0 : i32
    %c0_i32_1 = arith.constant 0 : i32
    return %c0_i32, %c0_i32_0 : i32, i32
  }
  func.func @transform_6(%arg0: i32) -> (i32, i32) {
    %c0_i32 = arith.constant 0 : i32
    %c0_i32_0 = arith.constant 0 : i32
    %c0_i32_1 = arith.constant 0 : i32
    return %c0_i32, %c0_i32_0 : i32, i32
  }
  func.func @transform_7(%arg0: i32) -> (i32, i32) {
    %c0_i32 = arith.constant 0 : i32
    %c0_i32_0 = arith.constant 0 : i32
    return %arg0, %c0_i32 : i32, i32
  }
}

</mosaic_0001>

<bundles_post_ra>
// kernel: tpu_custom_call.1
= control target key start
LH: loop header
LB: loop body
LE: loop exit
PB: predicated region body
PF: predicated region fallthrough
CT: control target
= control target key end

     0   :  { %12 = vsyncpa [#allocation3], 0  ;;  %s1333_s0 = inlined_call_operand.hbm [shape: f32[16,128], index: 0, kind: input, shape index: {}]   ;;  %s1334_s1 = inlined_call_operand.vmem [shape: f32[1,128], index: 1, kind: input, shape index: {}]   ;;  %s1335_s2 = inlined_call_operand.vmem [shape: f32[1,128], index: 2, kind: input, shape index: {}]   ;;  %s1336_s3 = inlined_call_operand.hbm [shape: bf16[128,128], index: 3, kind: input, shape index: {}]   ;;  %s1337_s4 = inlined_call_operand.vmem [shape: f32[1,128], index: 4, kind: input, shape index: {}]   ;;  %s1338_s5 = inlined_call_operand.hbm [shape: bf16[128,128], index: 5, kind: input, shape index: {}]   ;;  %s1339_s6 = inlined_call_operand.vmem [shape: f32[1,128], index: 6, kind: input, shape index: {}]   ;;  %s1340_s7 = inlined_call_operand.hbm [shape: f32[16,128], index: 7, kind: output, shape index: {}]  }
   0x1   :  { %14 = vsyncpa [#allocation3 + $0x1], 0 }
   0x2   :  { %15 = vsyncpa [#allocation6], 0 }
   0x3   :  { %16 = vsyncpa [#allocation4], 0 }
   0x4   :  { %18 = vsyncpa [#allocation4 + $0x1], 0  ;;  %s1070_s24 = smov 0   ;;  %s1072_s25 = smov 0  }
   0x5   :  { %s1074_s26 = smov 0   ;;  %s1076_s27 = smov 0  }
   0x6 LB: > { %s1091_s28 = sadd.s32 4294967295, %s1020_s27   ;;  %s681_s29 = sadd.s32 4294967294, %s1020_s27   ;;  %s1020_s27 = sphi %s1076_s27, %s1360_s27   ;;  %s1016_s26 = sphi %s1074_s26, %s1359_s26   ;;  %s1012_s25 = sphi %s1072_s25, %s1358_s25   ;;  %s1008_s24 = sphi %s1070_s24, %s1357_s24  }
   0x7   : > { %p44_p0 = scmp.ne.s32.totalorder %s1012_s25, %s1008_s24  ;;  %p1341_p1 = scmp.eq.s32.totalorder %s1091_s28, 0 }
   0x8   : > { %p200_p3 = scmp.eq.s32.totalorder %s681_s29, 1  ;;  %p682_p5 = scmp.ge.s32.totalorder %s1020_s27, 1 }
   0x9   : > { %p1100_p4 = por %p1341_p1, %p44_p0  ;;  %p207_p7 = scmp.lt.s32.totalorder %s1020_s27, 3 }
   0xa   : > { %p1105_p6 = por %p200_p3, %p44_p0  ;;  %s1022_s10 = smov [#allocation5]  }
   0xb   : > { %s1344_s30 = scalar_select %p1100_p4, 1, 0 }
   0xc   : > { %s1345_s8 = scalar_select %p1105_p6, 1, 0 }
   0xd   : > { %p1110_p8 = pnand %p682_p5, %p207_p7  ;;  %s225_s11 = sshll.u32 %s1022_s10, 4  ;;  %s1114_s11 = int_to_ptr.vmem [resolvable:$true] %s225_s11 }
   0xe   : > { %s1023_s13 = smov [#allocation7]   ;;  %s864_s17 = scalar_lea.hbm %s1336_s3, 1024 }
   0xf   : > { %p787_p9 = pneg %p1110_p8  ;;  %s241_s14 = sshll.u32 %s1023_s13, 4  ;;  %s1125_s14 = int_to_ptr.vmem [resolvable:$true] %s241_s14 }
  0x10   : > { %p865_p12 = scmp.ne.s32.totalorder %s1336_s3, %s864_s17  ;;  %p871_p5 = scmp.lt.u32.totalorder %s864_s17, %s1336_s3 }
  0x11   : > { %p1121_p11 = pnand %p787_p9, %p1341_p1 }
  0x13   : > { %p866_p13 = pneg %p1121_p11 }
  0x15   : > { %p867_p0 = pnand %p866_p13, %p865_p12 }
  0x17   : > { %p868_p3 = pneg %p867_p0 }
  0x19   : > { %p873_p7 = pnand %p871_p5, %p868_p3 }
  0x1b   : > { %876 = shalt.err (!%p873_p7)
}
  0x1c   : > { %s877_s22 = scalar_lea.vmem %s1114_s11, 1024  ;;  %p885_p2 = scmp.lt.s32.totalorder %s1114_s11, %s1114_s11 }
  0x1d   : > { %p878_p9 = scmp.ne.s32.totalorder %s1114_s11, %s877_s22  ;;  %p886_p12 = scmp.lt.s32.totalorder %s877_s22, %s877_s22 }
  0x1f   : > { %p880_p10 = pnand %p878_p9, %p866_p13  ;;  %p887_p0 = por %p886_p12, %p885_p2 }
  0x21   : > { %p881_p1 = pneg %p880_p10 }
  0x23   : > { %p888_p6 = pnand %p887_p0, %p881_p1 }
  0x25   : > { %891 = shalt.err (!%p888_p6)
}
  0x26   : > { %s1024_s23 = smov 64   ;;  %s1025_s29 = smov 4  }
  0x27   : > { %790 = dma.hbm_to_vmem [thread:$0]  (!%p1121_p11), %s1336_s3, 1024, %s1114_s11, [#allocation6], %s1024_s23, %s1024_s23, %s1025_s29  }
  0x28   : > { %s892_s17 = scalar_lea.hbm %s1338_s5, 1024 }
  0x29   : > { %p893_p2 = scmp.ne.s32.totalorder %s1338_s5, %s892_s17  ;;  %p899_p10 = scmp.lt.u32.totalorder %s892_s17, %s1338_s5 }
  0x2b   : > { %p895_p1 = pnand %p893_p2, %p866_p13 }
  0x2d   : > { %p896_p6 = pneg %p895_p1 }
  0x2f   : > { %p901_p3 = pnand %p899_p10, %p896_p6 }
  0x31   : > { %904 = shalt.err (!%p901_p3)
}
  0x32   : > { %s905_s11 = scalar_lea.vmem %s1125_s14, 1024  ;;  %p913_p12 = scmp.lt.s32.totalorder %s1125_s14, %s1125_s14 }
  0x33   : > { %p906_p5 = scmp.ne.s32.totalorder %s1125_s14, %s905_s11  ;;  %p914_p0 = scmp.lt.s32.totalorder %s905_s11, %s905_s11 }
  0x35   : > { %p908_p7 = pnand %p906_p5, %p866_p13  ;;  %p915_p2 = por %p914_p0, %p913_p12 }
  0x37   : > { %p909_p9 = pneg %p908_p7 }
  0x39   : > { %p916_p1 = pnand %p915_p2, %p909_p9 }
  0x3b   : > { %919 = shalt.err (!%p916_p1)
}
  0x3c   : > { %793 = dma.hbm_to_vmem [thread:$0]  (!%p1121_p11), %s1338_s5, 1024, %s1125_s14, [#allocation6], %s1024_s23, %s1024_s23, %s1025_s29  }
  0x3d   : > { %s1180_s13 = sadd.s32 1, %s1020_s27   ;;  %s31_s12 = sadd.s32 1, %s1016_s26 }
  0x3e   : > { %s28_s15 = ssub.s32 %s1020_s27, %s1180_s13  ;;  %p38_p13 = scmp.ne.s32.totalorder %s1016_s26, %s1012_s25 }
  0x3f   : > { %p29_p6 = scmp.eq.s32.totalorder %s28_s15, 0  ;;  %p39_p10 = scmp.eq.s32.totalorder %s1020_s27, 0 }
  0x40   : > { %p1348_p3 = scmp.eq.s32.totalorder %s1091_s28, 1  ;;  %p804_p7 = scmp.lt.s32.totalorder %s1020_s27, 2 }
  0x41   : > { %s1196_s17 = scalar_select %p29_p6, %s1016_s26, %s31_s12  }
  0x42   : > { %p1190_p5 = por %p1348_p3, %p38_p13  ;;  %p40_p9 = por %p39_p10, %p38_p13 }
  0x43   : > { %s258_s18 = sand.u32 1, %s1016_s26   ;;  %s687_s14 = sshll.u32 %s1020_s27, 7 }
  0x44   : > { %s1349_s16 = scalar_select %p1190_p5, 1, 0 }
  0x45   : > { %s686_s19 = sshll.u32 %s258_s18, 3  ;;  %s1203_s20 = scalar_lea.hbm %s1333_s0, %s687_s14 }
  0x46   : > { %s262_s21 = scalar_lea.vmem [#allocation2], %s686_s19  ;;  %p1207_p11 = pnand %p804_p7, %p40_p9 }
  0x47   : > { %s269_s11 = sshll.u32 %s262_s21, 4  ;;  %s259_s10 = scalar_lea.sflag [#allocation3], %s258_s18  ;;  %s1205_s11 = int_to_ptr.vmem [resolvable:$true] %s269_s11 }
  0x48   : > { %s920_s12 = scalar_lea.hbm %s1203_s20, 128  ;;  %p922_p0 = pneg %p1207_p11 }
  0x49   : > { %p921_p12 = scmp.ne.s32.totalorder %s1203_s20, %s920_s12  ;;  %s925_s14 = scalar_lea.hbm %s1333_s0, 256 }
  0x4a   : > { %p926_p13 = scmp.lt.u32.totalorder %s1203_s20, %s1333_s0  ;;  %p927_p6 = scmp.lt.u32.totalorder %s925_s14, %s920_s12 }
  0x4b   : > { %p923_p2 = pnand %p922_p0, %p921_p12  ;;  %p929_p3 = scmp.lt.u32.totalorder %s920_s12, %s1203_s20 }
  0x4c   : > { %p928_p10 = por %p927_p6, %p926_p13 }
  0x4d   : > { %p924_p1 = pneg %p923_p2 }
  0x4e   : > { %p930_p7 = por %p929_p3, %p928_p10 }
  0x50   : > { %p931_p9 = pnand %p930_p7, %p924_p1 }
  0x52   : > { %934 = shalt.err (!%p931_p9)
}
  0x53   : > { %s935_s18 = scalar_lea.vmem %s1205_s11, 128  ;;  %s1026_s21 = smov [#allocation2]  }
  0x54   : > { %p936_p12 = scmp.ne.s32.totalorder %s1205_s11, %s935_s18  ;;  %s940_s15 = sshll.u32 %s1026_s21, 4  ;;  %s941_s15 = int_to_ptr.vmem [resolvable:$false] %s940_s15 }
  0x55   : > { %s942_s19 = scalar_lea.vmem %s941_s15, 256  ;;  %p943_p4 = scmp.lt.s32.totalorder %s1205_s11, %s941_s15 }
  0x56   : > { %p938_p2 = pnand %p936_p12, %p922_p0  ;;  %p944_p13 = scmp.lt.s32.totalorder %s942_s19, %s935_s18 }
  0x58   : > { %p939_p5 = pneg %p938_p2  ;;  %p945_p6 = por %p944_p13, %p943_p4 }
  0x5a   : > { %p946_p10 = pnand %p945_p6, %p939_p5 }
  0x5c   : > { %949 = shalt.err (!%p946_p10)
}
  0x5d   : > { %797 = dma.hbm_to_vmem [thread:$0]  (!%p1207_p11), %s1203_s20, 128, %s1205_s11, %s259_s10  }
  0x5e   : > { %278 = sbr.rel (%p1110_p8) target bundleno = 865 (0x361), region = 48  ;;  %s1239_s12 = sand.u32 (!%p1110_p8), 1, %s1012_s25  }
  0x5f   : > { %s689_s14 = sshll.u32 (!%p1110_p8), %s1239_s12, 3  ;;  %s281_s23 = scalar_lea.sflag (!%p1110_p8), [#allocation3], %s1239_s12 }
  0x60   : > { %s284_s29 = scalar_lea.vmem (!%p1110_p8), [#allocation2], %s689_s14  ;;  %p1351_p4 = scmp.ne.s32.totalorder (!%p1110_p8), %s1344_s30, 0 }
  0x65   : > { %995 = dma.done.wait (%p1351_p4), %s281_s23, 128  }
  0x66   : > { %997 = vsyncadd (%p1351_p4), %s281_s23, 4294967168  ;;  %p1352_p5 = scmp.eq.s32.totalorder %s1091_s28, 0 }
  0x68   : > { %999 = dma.done.wait (%p1352_p5), [#allocation6], 2048   ;;  %p1353_p8 = pmov %p1352_p5 }
  0x69   : > { %v324_v0 = vld [vmem:[%s284_s29] sm:$0xff]  ;;  %v846_v1 = vld [vmem:[#allocation5] sm:$0xff]   ;;  %v1027_v2 = vmov 0.0   ;;  %v847_v3 = vld [vmem:[#allocation5 + $0x8] sm:$0xff]   ;;  %vm1028_vm0 = vmmov 0   ;;  %s714_s15 = sshll.u32 %s1091_s28, 7 }
  0x6a   : > { %1001 = vsyncadd (%p1353_p8), [#allocation6], 4294965248  ;;  %325 = vadd.xlane.f32.xlu0 %v324_v0  ;;  %735 = vmatprep.subr.bf16.mxu0 %v1027_v2  ;;  %v848_v8 = vld [vmem:[#allocation5 + $0x10] sm:$0xff]   ;;  %v849_v9 = vld [vmem:[#allocation5 + $0x18] sm:$0xff]   ;;  %s322_s19 = scalar_lea.vmem [#allocation8], %s689_s14  ;;  %s1289_s9 = scalar_lea.hbm %s1340_s7, %s714_s15 }
  0x6b   : > { %755 = vmatprep.subr.bf16.mxu1 %v1027_v2  ;;  %736 = vmatpush3.bf16.msra.mxu0 %v846_v1  ;;  %v850_v10 = vld [vmem:[#allocation5 + $0x20] sm:$0xff]   ;;  %v851_v11 = vld [vmem:[#allocation5 + $0x28] sm:$0xff]   ;;  %v852_v12 = vld [vmem:[#allocation5 + $0x30] sm:$0xff]   ;;  %s592_s23 = sshll.u32 %s322_s19, 4  ;;  %s579_s28 = scalar_lea.sflag [#allocation4], %s1239_s12  ;;  %s1291_s23 = int_to_ptr.vmem [resolvable:$true] %s592_s23 }
  0x6c   : > { %737 = vmatprep.subr.bf16.mxu0 %v1027_v2  ;;  %751 = vmatprep.mubr.msk.bf16.mxu0 %vm1028_vm0, %v1027_v2  ;;  %v853_v13 = vld [vmem:[#allocation5 + $0x38] sm:$0xff]   ;;  %v854_v14 = vld [vmem:[#allocation7] sm:$0xff]   ;;  %v855_v15 = vld [vmem:[#allocation7 + $0x8] sm:$0xff]   ;;  %s950_s20 = scalar_lea.vmem %s1291_s23, 128  ;;  %p1354_p0 = scmp.ne.s32.totalorder %s1349_s16, 0 }
  0x6d   : > { %771 = vmatprep.mubr.msk.bf16.mxu1 %vm1028_vm0, %v1027_v2  ;;  %756 = vmatpush3.bf16.msra.mxu1 %v854_v14  ;;  %v856_v16 = vld [vmem:[#allocation7 + $0x10] sm:$0xff]   ;;  %v857_v17 = vld [vmem:[#allocation7 + $0x18] sm:$0xff]   ;;  %v858_v18 = vld [vmem:[#allocation7 + $0x20] sm:$0xff]   ;;  %p951_p11 = scmp.ne.s32.totalorder %s1291_s23, %s950_s20  ;;  %s1029_s14 = smov [#allocation8]  }
  0x6e   : > { %757 = vmatprep.subr.bf16.mxu1 %v1027_v2  ;;  %v859_v19 = vld [vmem:[#allocation7 + $0x28] sm:$0xff]   ;;  %v693_v24 = vld [vmem:[%s1334_s1] ss:$0 sm:$0xff]  ;;  %v861_v31 = vld [vmem:[#allocation7 + $0x38] sm:$0xff]   ;;  %s954_s11 = sshll.u32 %s1029_s14, 4  ;;  %s955_s11 = int_to_ptr.vmem [resolvable:$false] %s954_s11 }
  0x6f   : > { %738 = vmatpush3.bf16.msra.mxu0 %v847_v3  ;;  %v694_v26 = vld [vmem:[%s1335_s2] ss:$0 sm:$0xff]  ;;  %p952_p1 = pnand %p951_p11, %p1354_p0  ;;  %s956_s22 = scalar_lea.vmem %s955_s11, 256 }
  0x70   : > { %739 = vmatprep.subr.bf16.mxu0 %v1027_v2  ;;  %v860_v30 = vld [vmem:[#allocation7 + $0x30] sm:$0xff]   ;;  %p957_p7 = scmp.lt.s32.totalorder %s1291_s23, %s955_s11  ;;  %p958_p9 = scmp.lt.s32.totalorder %s956_s22, %s950_s20 }
  0x71   : > { %758 = vmatpush3.bf16.msra.mxu1 %v855_v15  ;;  %v695_v32 = vld [vmem:[%s1337_s4] ss:$0 sm:$0xff]  ;;  %p953_p3 = pneg %p952_p1 }
  0x72   : > { %759 = vmatprep.subr.bf16.mxu1 %v1027_v2  ;;  %v704_v40 = vld [vmem:[%s1339_s6] ss:$0 sm:$0xff]  ;;  %p959_p12 = por %p958_p9, %p957_p7 }
  0x73   : > { %740 = vmatpush3.bf16.msra.mxu0 %v848_v8 }
  0x74   : > { %741 = vmatprep.subr.bf16.mxu0 %v1027_v2  ;;  %p960_p2 = pnand %p959_p12, %p953_p3 }
  0x75   : > { %760 = vmatpush3.bf16.msra.mxu1 %v856_v16 }
  0x76   : > { %761 = vmatprep.subr.bf16.mxu1 %v1027_v2 }
  0x77   : > { %742 = vmatpush3.bf16.msra.mxu0 %v849_v9 }
  0x78   : > { %743 = vmatprep.subr.bf16.mxu0 %v1027_v2 }
  0x79   : > { %762 = vmatpush3.bf16.msra.mxu1 %v857_v17 }
  0x7a   : > { %763 = vmatprep.subr.bf16.mxu1 %v1027_v2 }
  0x7b   : > { %744 = vmatpush3.bf16.msra.mxu0 %v850_v10 }
  0x7c   : > { %745 = vmatprep.subr.bf16.mxu0 %v1027_v2 }
  0x7d   : > { %764 = vmatpush3.bf16.msra.mxu1 %v858_v18 }
  0x7e   : > { %765 = vmatprep.subr.bf16.mxu1 %v1027_v2 }
  0x7f   : > { %746 = vmatpush3.bf16.msra.mxu0 %v851_v11 }
  0x80   : > { %747 = vmatprep.subr.bf16.mxu0 %v1027_v2 }
  0x81   : > { %766 = vmatpush3.bf16.msra.mxu1 %v859_v19 }
  0x82   : > { %767 = vmatprep.subr.bf16.mxu1 %v1027_v2 }
  0x83   : > { %748 = vmatpush3.bf16.msra.mxu0 %v852_v12 }
  0x84   : > { %749 = vmatprep.subr.bf16.mxu0 %v1027_v2 }
  0x85   : > { %768 = vmatpush3.bf16.msra.mxu1 %v860_v30 }
  0x86   : > { %769 = vmatprep.subr.bf16.mxu1 %v1027_v2 }
  0x87   : > { %750 = vmatpush3.bf16.msra.mxu0 %v853_v13 }
  0x89   : > { %770 = vmatpush3.bf16.msra.mxu1 %v861_v31 }
  0xf7   : > { %v326_v4 = vpop.xlane.xlu0 %325 }
  0xf8   : > { %v327_v5 = vmul.f32 0.0078125, %v326_v4 }
  0xfa   : > { %v328_v6 = vsub.f32 %v324_v0, %v327_v5 }
  0xfc   : > { %v329_v7 = vmul.f32 %v328_v6, %v328_v6 }
  0xfe   : > { %330 = vadd.xlane.f32.xlu0 %v329_v7 }
 0x18b   : > { %v331_v20 = vpop.xlane.xlu0 %330 }
 0x18c   : > { %v332_v21 = vmul.f32 0.0078125, %v331_v20 }
 0x18e   : > { %v333_v22 = vadd.f32 1e-05, %v332_v21 }
 0x190   : > { %862 = vrsqrt.f32 %v333_v22 }
 0x19a   : > { %v863_v23 = vpop.eup %862 }
 0x19b   : > { %v335_v25 = vmul.f32 %v863_v23, %v328_v6 }
 0x19d   : > { %v343_v27 = vmul.f32 %v693_v24, %v335_v25 }
 0x19f   : > { %v351_v28 = vadd.f32 %v694_v26, %v343_v27 }
 0x1a1   : > { %v352_v29 = vpack.c.bf16 %v351_v28, %v351_v28 }
 0x1a3   : > { %752 = vmatmul.mubr.bf16.vlgmr.msra.gmra.mrb[0].mxu0 %v352_v29 }
 0x276   : > { %v458_v33 = vpop.f32.mrb[0].mxu0 }
 0x277   : > { %v459_v34 = vadd.f32 %v695_v32, %v458_v33  ;;  %v753_v35 = vpop.f32.mrb[1].mxu0 }
 0x278   : > { %v461_v36 = vpop.f32.mrb[2].mxu0 }
 0x279   : > { %v464_v37 = vmax.f32 %v459_v34, 0.0  ;;  %v754_v38 = vpop.f32.mrb[3].mxu0 }
 0x27b   : > { %v465_v39 = vpack.c.bf16 %v464_v37, %v464_v37 }
 0x27d   : > { %772 = vmatmul.mubr.bf16.vlgmr.msra.gmra.mrb[0].mxu1 %v465_v39 }
 0x350   : > { %v571_v41 = vpop.f32.mrb[0].mxu1 }
 0x351   : > { %v572_v42 = vadd.f32 %v704_v40, %v571_v41  ;;  %v773_v43 = vpop.f32.mrb[1].mxu1 }
 0x352   : > { %v574_v44 = vpop.f32.mrb[2].mxu1 }
 0x353   : > { %577 = vst [vmem:[%s322_s19] sm:$0xff] %v572_v42  ;;  %v774_v45 = vpop.f32.mrb[3].mxu1 }
 0x354   : > { %963 = shalt.err (!%p960_p2)
}
 0x355   : > { %s964_s12 = scalar_lea.hbm %s1289_s9, 128  ;;  %s968_s21 = scalar_lea.hbm %s1340_s7, 256 }
 0x356   : > { %p965_p13 = scmp.ne.s32.totalorder %s1289_s9, %s964_s12  ;;  %p969_p4 = scmp.lt.u32.totalorder %s1289_s9, %s1340_s7 }
 0x357   : > { %p970_p5 = scmp.lt.u32.totalorder %s968_s21, %s964_s12  ;;  %p972_p11 = scmp.lt.u32.totalorder %s964_s12, %s1289_s9 }
 0x358   : > { %p966_p6 = pnand %p965_p13, %p1354_p0 }
 0x359   : > { %p971_p8 = por %p970_p5, %p969_p4 }
 0x35a   : > { %p967_p10 = pneg %p966_p6 }
 0x35b   : > { %p973_p1 = por %p972_p11, %p971_p8 }
 0x35d   : > { %p974_p3 = pnand %p973_p1, %p967_p10 }
 0x35f   : > { %977 = shalt.err (!%p974_p3)
}
 0x360   : > { %785 = dma.vmem_to_hbm [thread:$0]  (%p1354_p0), %s1291_s23, 128, %s1289_s9, %s579_s28  }
 0x361 PF: > { %s604_s29 = sand.u32 1, %s1008_s24   ;;  %p1355_p7 = scmp.ne.s32.totalorder %s1345_s8, 0 }
 0x362   : > { %p1356_p9 = scmp.ge.s32.totalorder %s1020_s27, 2  ;;  %s605_s30 = scalar_lea.sflag [#allocation4], %s604_s29 }
 0x364   : > { %p799_p12 = pnand %p1356_p9, %p1355_p7 }
 0x366   : > { %1003 = dma.done.wait (!%p799_p12), %s605_s30, 128  }
 0x367   : > { %1005 = vsyncadd (!%p799_p12), %s605_s30, 4294967168  ;;  %p21_p2 = scmp.ge.s32.totalorder %s1180_s13, 4   ;;  %s1357_s24 = smov %s1012_s25 }
 0x368   : > { %s1358_s25 = smov %s1016_s26  ;;  %s1359_s26 = smov %s1196_s17 }
 0x369   : > { %s1360_s27 = smov %s1180_s13  ;;  %23 = sbr.rel (!%p21_p2) target bundleno = 6 (0x6), region = 101 }
 0x370   :  { %610 = vsyncpa [#allocation3], 1 }
 0x371   :  { %612 = vsyncpa [#allocation3 + $0x1], 1 }
 0x372   :  { %613 = vsyncpa [#allocation6], 1 }
 0x373   :  { %614 = vsyncpa [#allocation4], 1 }
 0x374   :  { %616 = vsyncpa [#allocation4 + $0x1], 1 }

</bundles_post_ra>
